<compile_context>
chip_gen: v7x
topology: tpu7x:2x2x1
jax: 0.10.0
libtpu: 0.0.40
codegen_flags: <defaults>
</compile_context>

<pallas_src>
import functools

import jax
import jax.numpy as jnp
from jax.experimental import pallas as pl
from jax.experimental.pallas import tpu as pltpu


def _focal_loss_kernel(logit_ref, tgt_ref, alpha_ref, out_ref, *, gamma, num_class):
    C = num_class
    t = tgt_ref[0, 0]                       # (R, 128) int32; padded pixels hold sentinel C
    a = alpha_ref[...]                      # (C, 128) f32; row c = alpha_c replicated

    # Pass 1 over classes: running max, raw target-logit gather, alpha gather.
    # All ops are full-density (R, 128) VPU work.
    x0 = logit_ref[0, 0].astype(jnp.float32)
    m = x0
    sel = t == 0
    xt = jnp.where(sel, x0, 0.0)            # logit of the target class
    at = jnp.where(sel, a[0:1, :], 0.0)     # alpha of the target class
    for c in range(1, C):
        xc = logit_ref[0, c].astype(jnp.float32)
        m = jnp.maximum(m, xc)
        sel = t == c
        xt = jnp.where(sel, xc, xt)
        at = jnp.where(sel, a[c:c + 1, :], at)

    # Pass 2 over classes: sum_c exp(x_c - m)  (softmax denominator).
    s = jnp.exp(logit_ref[0, 0].astype(jnp.float32) - m)
    for c in range(1, C):
        s = s + jnp.exp(logit_ref[0, c].astype(jnp.float32) - m)

    lse = jnp.log(s)
    logpt = (xt - m) - lse                  # log p_t  (= -CE)
    pt = jnp.exp(logpt)
    # exp rounding can give pt slightly > 1 -> keep the focal base non-negative
    omp = jnp.maximum(1.0 - pt, 0.0)

    g = float(gamma)
    gi = int(g)
    if g == gi and 0 <= gi <= 4:
        # small integer gamma: multiply chain, no pow (= exp+log on the EUP)
        if gi == 0:
            w = jnp.ones_like(omp)
        else:
            w = omp
            for _ in range(gi - 1):
                w = w * omp
    else:
        w = omp ** jnp.float32(g)

    focal = -(at * w) * logpt               # (R, 128); padded pixels: at == 0 -> 0

    # Fold rows into an (8, 128) partial sum with independent accumulators
    # (breaks the serial add chain; dense (8,128) chunks, no relayout).
    R = focal.shape[0]                      # multiple of 8 by construction
    n_chunks = R // 8
    n_acc = min(4, n_chunks)
    accs = [focal[i * 8:(i + 1) * 8, :] for i in range(n_acc)]
    for i in range(n_acc, n_chunks):
        accs[i % n_acc] = accs[i % n_acc] + focal[i * 8:(i + 1) * 8, :]
    acc = accs[0]
    for i in range(1, n_acc):
        acc = acc + accs[i]
    out_ref[0, 0] = acc


def _round_up(x, m):
    return ((x + m - 1) // m) * m


def _pick_tile_hw(num_class, hw):
    # VMEM budget: double-buffered inputs (C f32 logits + 1 i32 target per pixel)
    # plus ~8 live f32 per-pixel intermediates in the compute body.
    bytes_per_px = 2 * (num_class + 1) * 4 + 8 * 4
    budget = 10 * 1024 * 1024          # fits v5e's 16 MiB scoped-VMEM default
    tile = budget // bytes_per_px
    tile = min(tile, 32 * 1024)        # keep the grid populated (v7x megacore)
    tile = max(1024, (tile // 1024) * 1024)     # multiple of 8*128
    return min(tile, _round_up(hw, 1024))


def focal_loss_v2(logit, target, alpha, gamma=2.0, tile_hw=None):
    """logit: (N, C, *spatial) float, target: (N, *spatial) int, alpha: (C,) float."""
    N, C = logit.shape[0], logit.shape[1]
    hw = 1
    for d in logit.shape[2:]:
        hw *= d

    tile = int(tile_hw) if tile_hw is not None else _pick_tile_hw(C, hw)
    tile = max(1024, (tile // 1024) * 1024)
    tile = min(tile, _round_up(hw, 1024))
    hw_pad = _round_up(hw, tile)       # multiple of tile: last block never OOB
    n_hw = hw_pad // tile
    t_rows = tile // 128               # multiple of 8
    r_total = hw_pad // 128

    # NCHW-native: spatial axis split over (rows, 128 lanes); classes on axis 1.
    x = logit.reshape(N, C, hw)
    t = target.reshape(N, 1, hw).astype(jnp.int32)
    if hw_pad != hw:
        x = jnp.pad(x, ((0, 0), (0, 0), (0, hw_pad - hw)))
        # sentinel class C on padded pixels -> alpha_t = 0 -> zero loss contribution
        t = jnp.pad(t, ((0, 0), (0, 0), (0, hw_pad - hw)), constant_values=C)
    x = x.reshape(N, C, r_total, 128)
    t = t.reshape(N, 1, r_total, 128)

    alpha_b = jnp.broadcast_to(
        jnp.asarray(alpha, jnp.float32).reshape(C, 1), (C, 128))

    kernel = functools.partial(_focal_loss_kernel, gamma=float(gamma), num_class=C)

    partials = pl.pallas_call(
        kernel,
        out_shape=jax.ShapeDtypeStruct((N, n_hw, 8, 128), jnp.float32),
        grid_spec=pltpu.PrefetchScalarGridSpec(
            num_scalar_prefetch=0,
            grid=(N, n_hw),
            in_specs=[
                pl.BlockSpec((1, C, t_rows, 128), lambda n, j: (n, 0, j, 0)),
                pl.BlockSpec((1, 1, t_rows, 128), lambda n, j: (n, 0, j, 0)),
                pl.BlockSpec((C, 128), lambda n, j: (0, 0)),
            ],
            out_specs=pl.BlockSpec((1, 1, 8, 128), lambda n, j: (n, j, 0, 0)),
        ),
        compiler_params=pltpu.CompilerParams(
            dimension_semantics=("parallel", "parallel"),
            vmem_limit_bytes=32 * 1024 * 1024),
    )(x, t, alpha_b)

    # Mean over the N*hw real pixels (padded pixels contribute exactly 0).
    return jnp.sum(partials) / jnp.float32(N * hw)


def _reference(logit, target, alpha, gamma=2.0):
    N, C = logit.shape[0], logit.shape[1]
    x = logit.reshape(N, C, -1).transpose(0, 2, 1).reshape(-1, C).astype(jnp.float32)
    t = target.reshape(-1).astype(jnp.int32)
    logp = jax.nn.log_softmax(x, axis=-1)
    logpt = jnp.take_along_axis(logp, t[:, None], axis=-1)[:, 0]
    pt = jnp.exp(logpt)
    a = alpha[t]
    fl = -(a * (1.0 - pt) ** gamma) * logpt
    return jnp.mean(fl)


if __name__ == "__main__":
    key = jax.random.PRNGKey(0)
    k1, k2 = jax.random.split(key)

    num_class = 4
    N, C, H, W = 2, num_class, 16, 16
    logit = jax.random.normal(k1, (N, C, H, W), dtype=jnp.float32)
    target = jax.random.randint(k2, (N, H, W), 0, num_class, dtype=jnp.int32)

    # alpha=None path of the PyTorch module: ones(num_class) (unnormalized)
    alpha = jnp.ones((num_class,), dtype=jnp.float32)

    loss = focal_loss_v2(logit, target, alpha, gamma=2.0)
    loss = jax.block_until_ready(loss)

    ref = _reference(logit, target, alpha, gamma=2.0)
    assert jnp.allclose(loss, ref, atol=1e-5, rtol=1e-5), (loss, ref)

    print("KERNEL_OK")
</pallas_src>

<mosaic_0001>
module attributes {stable_mosaic.version = 11 : i64} {
  func.func @_focal_loss_kernel(%arg0: i32, %arg1: i32, %arg2: memref<1x4x8x128xf32, #tpu.memory_space<vmem>>, %arg3: memref<1x1x8x128xi32, #tpu.memory_space<vmem>>, %arg4: memref<4x128xf32, #tpu.memory_space<vmem>>, %arg5: memref<1x1x8x128xf32, #tpu.memory_space<vmem>>) attributes {dimension_semantics = [#tpu.dimension_semantics<parallel>, #tpu.dimension_semantics<parallel>], iteration_bounds = array<i64: 2, 1>, scalar_prefetch = 0 : i64, scratch_operands = 0 : i64, tpu.core_type = #tpu.core_type<tc>, window_params = [{transform_indices = @transform_0, window_bounds = array<i64: 1, 4, 8, 128>}, {transform_indices = @transform_1, window_bounds = array<i64: 1, 1, 8, 128>}, {pipeline_mode = #tpu.pipeline_mode<synchronous>, transform_indices = @transform_2, window_bounds = array<i64: 4, 128>}, {transform_indices = @transform_3, window_bounds = array<i64: 1, 1, 8, 128>}]} {
    %c0 = arith.constant 0 : index
    %c0_0 = arith.constant 0 : index
    %c0_1 = arith.constant 0 : index
    %c0_2 = arith.constant 0 : index
    %0 = vector.load %arg3[%c0, %c0_0, %c0_1, %c0_2] : memref<1x1x8x128xi32, #tpu.memory_space<vmem>>, vector<1x1x8x128xi32>
    %1 = vector.shape_cast %0 : vector<1x1x8x128xi32> to vector<8x128xi32>
    %c0_3 = arith.constant 0 : index
    %c0_4 = arith.constant 0 : index
    %2 = vector.load %arg4[%c0_3, %c0_4] : memref<4x128xf32, #tpu.memory_space<vmem>>, vector<4x128xf32>
    %c0_5 = arith.constant 0 : index
    %c0_6 = arith.constant 0 : index
    %c0_7 = arith.constant 0 : index
    %c0_8 = arith.constant 0 : index
    %3 = vector.load %arg2[%c0_5, %c0_6, %c0_7, %c0_8] : memref<1x4x8x128xf32, #tpu.memory_space<vmem>>, vector<1x1x8x128xf32>
    %4 = vector.shape_cast %3 : vector<1x1x8x128xf32> to vector<8x128xf32>
    %c0_i32 = arith.constant 0 : i32
    %5 = vector.broadcast %c0_i32 : i32 to vector<8x128xi32>
    %6 = arith.cmpi eq, %1, %5 : vector<8x128xi32>
    %cst = arith.constant 0.000000e+00 : f32
    %7 = vector.broadcast %cst : f32 to vector<8x128xf32>
    %8 = arith.select %6, %4, %7 : vector<8x128xi1>, vector<8x128xf32>
    %9 = vector.extract_strided_slice %2 {offsets = [0, 0], sizes = [1, 128], strides = [1, 1]} : vector<4x128xf32> to vector<1x128xf32>
    %cst_9 = arith.constant 0.000000e+00 : f32
    %10 = vector.shape_cast %9 : vector<1x128xf32> to vector<1x128xf32>
    %11 = vector.broadcast %10 : vector<1x128xf32> to vector<8x128xf32>
    %12 = vector.broadcast %cst_9 : f32 to vector<8x128xf32>
    %13 = arith.select %6, %11, %12 : vector<8x128xi1>, vector<8x128xf32>
    %c0_10 = arith.constant 0 : index
    %c1 = arith.constant 1 : index
    %c0_11 = arith.constant 0 : index
    %c0_12 = arith.constant 0 : index
    %14 = vector.load %arg2[%c0_10, %c1, %c0_11, %c0_12] : memref<1x4x8x128xf32, #tpu.memory_space<vmem>>, vector<1x1x8x128xf32>
    %15 = vector.shape_cast %14 : vector<1x1x8x128xf32> to vector<8x128xf32>
    %16 = arith.maximumf %4, %15 : vector<8x128xf32>
    %c1_i32 = arith.constant 1 : i32
    %17 = vector.broadcast %c1_i32 : i32 to vector<8x128xi32>
    %18 = arith.cmpi eq, %1, %17 : vector<8x128xi32>
    %19 = arith.select %18, %15, %8 : vector<8x128xi1>, vector<8x128xf32>
    %20 = vector.extract_strided_slice %2 {offsets = [1, 0], sizes = [1, 128], strides = [1, 1]} : vector<4x128xf32> to vector<1x128xf32>
    %21 = vector.shape_cast %20 : vector<1x128xf32> to vector<1x128xf32>
    %22 = vector.broadcast %21 : vector<1x128xf32> to vector<8x128xf32>
    %23 = arith.select %18, %22, %13 : vector<8x128xi1>, vector<8x128xf32>
    %c0_13 = arith.constant 0 : index
    %c2 = arith.constant 2 : index
    %c0_14 = arith.constant 0 : index
    %c0_15 = arith.constant 0 : index
    %24 = vector.load %arg2[%c0_13, %c2, %c0_14, %c0_15] : memref<1x4x8x128xf32, #tpu.memory_space<vmem>>, vector<1x1x8x128xf32>
    %25 = vector.shape_cast %24 : vector<1x1x8x128xf32> to vector<8x128xf32>
    %26 = arith.maximumf %16, %25 : vector<8x128xf32>
    %c2_i32 = arith.constant 2 : i32
    %27 = vector.broadcast %c2_i32 : i32 to vector<8x128xi32>
    %28 = arith.cmpi eq, %1, %27 : vector<8x128xi32>
    %29 = arith.select %28, %25, %19 : vector<8x128xi1>, vector<8x128xf32>
    %30 = vector.extract_strided_slice %2 {offsets = [2, 0], sizes = [1, 128], strides = [1, 1]} : vector<4x128xf32> to vector<1x128xf32>
    %31 = vector.shape_cast %30 : vector<1x128xf32> to vector<1x128xf32>
    %32 = vector.broadcast %31 : vector<1x128xf32> to vector<8x128xf32>
    %33 = arith.select %28, %32, %23 : vector<8x128xi1>, vector<8x128xf32>
    %c0_16 = arith.constant 0 : index
    %c3 = arith.constant 3 : index
    %c0_17 = arith.constant 0 : index
    %c0_18 = arith.constant 0 : index
    %34 = vector.load %arg2[%c0_16, %c3, %c0_17, %c0_18] : memref<1x4x8x128xf32, #tpu.memory_space<vmem>>, vector<1x1x8x128xf32>
    %35 = vector.shape_cast %34 : vector<1x1x8x128xf32> to vector<8x128xf32>
    %36 = arith.maximumf %26, %35 : vector<8x128xf32>
    %c3_i32 = arith.constant 3 : i32
    %37 = vector.broadcast %c3_i32 : i32 to vector<8x128xi32>
    %38 = arith.cmpi eq, %1, %37 : vector<8x128xi32>
    %39 = arith.select %38, %35, %29 : vector<8x128xi1>, vector<8x128xf32>
    %40 = vector.extract_strided_slice %2 {offsets = [3, 0], sizes = [1, 128], strides = [1, 1]} : vector<4x128xf32> to vector<1x128xf32>
    %41 = vector.shape_cast %40 : vector<1x128xf32> to vector<1x128xf32>
    %42 = vector.broadcast %41 : vector<1x128xf32> to vector<8x128xf32>
    %43 = arith.select %38, %42, %33 : vector<8x128xi1>, vector<8x128xf32>
    %c0_19 = arith.constant 0 : index
    %c0_20 = arith.constant 0 : index
    %c0_21 = arith.constant 0 : index
    %c0_22 = arith.constant 0 : index
    %44 = vector.load %arg2[%c0_19, %c0_20, %c0_21, %c0_22] : memref<1x4x8x128xf32, #tpu.memory_space<vmem>>, vector<1x1x8x128xf32>
    %45 = vector.shape_cast %44 : vector<1x1x8x128xf32> to vector<8x128xf32>
    %46 = arith.subf %45, %36 : vector<8x128xf32>
    %47 = math.exp %46 : vector<8x128xf32>
    %c0_23 = arith.constant 0 : index
    %c1_24 = arith.constant 1 : index
    %c0_25 = arith.constant 0 : index
    %c0_26 = arith.constant 0 : index
    %48 = vector.load %arg2[%c0_23, %c1_24, %c0_25, %c0_26] : memref<1x4x8x128xf32, #tpu.memory_space<vmem>>, vector<1x1x8x128xf32>
    %49 = vector.shape_cast %48 : vector<1x1x8x128xf32> to vector<8x128xf32>
    %50 = arith.subf %49, %36 : vector<8x128xf32>
    %51 = math.exp %50 : vector<8x128xf32>
    %52 = arith.addf %47, %51 : vector<8x128xf32>
    %c0_27 = arith.constant 0 : index
    %c2_28 = arith.constant 2 : index
    %c0_29 = arith.constant 0 : index
    %c0_30 = arith.constant 0 : index
    %53 = vector.load %arg2[%c0_27, %c2_28, %c0_29, %c0_30] : memref<1x4x8x128xf32, #tpu.memory_space<vmem>>, vector<1x1x8x128xf32>
    %54 = vector.shape_cast %53 : vector<1x1x8x128xf32> to vector<8x128xf32>
    %55 = arith.subf %54, %36 : vector<8x128xf32>
    %56 = math.exp %55 : vector<8x128xf32>
    %57 = arith.addf %52, %56 : vector<8x128xf32>
    %c0_31 = arith.constant 0 : index
    %c3_32 = arith.constant 3 : index
    %c0_33 = arith.constant 0 : index
    %c0_34 = arith.constant 0 : index
    %58 = vector.load %arg2[%c0_31, %c3_32, %c0_33, %c0_34] : memref<1x4x8x128xf32, #tpu.memory_space<vmem>>, vector<1x1x8x128xf32>
    %59 = vector.shape_cast %58 : vector<1x1x8x128xf32> to vector<8x128xf32>
    %60 = arith.subf %59, %36 : vector<8x128xf32>
    %61 = math.exp %60 : vector<8x128xf32>
    %62 = arith.addf %57, %61 : vector<8x128xf32>
    %63 = math.log %62 : vector<8x128xf32>
    %64 = arith.subf %39, %36 : vector<8x128xf32>
    %65 = arith.subf %64, %63 : vector<8x128xf32>
    %66 = math.exp %65 : vector<8x128xf32>
    %cst_35 = arith.constant 1.000000e+00 : f32
    %67 = vector.broadcast %cst_35 : f32 to vector<8x128xf32>
    %68 = arith.subf %67, %66 : vector<8x128xf32>
    %cst_36 = arith.constant 0.000000e+00 : f32
    %69 = vector.broadcast %cst_36 : f32 to vector<8x128xf32>
    %70 = arith.maximumf %68, %69 : vector<8x128xf32>
    %71 = arith.mulf %70, %70 : vector<8x128xf32>
    %72 = arith.mulf %43, %71 : vector<8x128xf32>
    %cst_37 = arith.constant 0.000000e+00 : f32
    %73 = vector.broadcast %cst_37 : f32 to vector<8x128xf32>
    %74 = arith.subf %73, %72 : vector<8x128xf32>
    %75 = arith.mulf %74, %65 : vector<8x128xf32>
    %c0_38 = arith.constant 0 : index
    %c0_39 = arith.constant 0 : index
    %c0_40 = arith.constant 0 : index
    %c0_41 = arith.constant 0 : index
    %76 = vector.load %arg5[%c0_38, %c0_39, %c0_40, %c0_41] : memref<1x1x8x128xf32, #tpu.memory_space<vmem>>, vector<1x1x8x128xf32>
    %77 = vector.shape_cast %76 : vector<1x1x8x128xf32> to vector<8x128xf32>
    %78 = vector.shape_cast %75 : vector<8x128xf32> to vector<1x1x8x128xf32>
    tpu.vector_store %arg5[%c0_38, %c0_39, %c0_40, %c0_41], %78 {strides = array<i32>} : memref<1x1x8x128xf32, #tpu.memory_space<vmem>>, vector<1x1x8x128xf32>,
    return
  }
  func.func @transform_0(%arg0: i32, %arg1: i32) -> (i32, i32, i32, i32) {
    %c0_i32 = arith.constant 0 : i32
    %c0_i32_0 = arith.constant 0 : i32
    %c0_i32_1 = arith.constant 0 : i32
    return %arg0, %c0_i32, %arg1, %c0_i32_0 : i32, i32, i32, i32
  }
  func.func @transform_1(%arg0: i32, %arg1: i32) -> (i32, i32, i32, i32) {
    %c0_i32 = arith.constant 0 : i32
    %c0_i32_0 = arith.constant 0 : i32
    %c0_i32_1 = arith.constant 0 : i32
    return %arg0, %c0_i32, %arg1, %c0_i32_0 : i32, i32, i32, i32
  }
  func.func @transform_2(%arg0: i32, %arg1: i32) -> (i32, i32) {
    %c0_i32 = arith.constant 0 : i32
    %c0_i32_0 = arith.constant 0 : i32
    %c0_i32_1 = arith.constant 0 : i32
    return %c0_i32, %c0_i32_0 : i32, i32
  }
  func.func @transform_3(%arg0: i32, %arg1: i32) -> (i32, i32, i32, i32) {
    %c0_i32 = arith.constant 0 : i32
    %c0_i32_0 = arith.constant 0 : i32
    %c0_i32_1 = arith.constant 0 : i32
    return %arg0, %arg1, %c0_i32, %c0_i32_0 : i32, i32, i32, i32
  }
}

</mosaic_0001>

<bundles_post_ra>
// kernel: tpu_custom_call.1
= control target key start
LH: loop header
LB: loop body
LE: loop exit
PB: predicated region body
PF: predicated region fallthrough
CT: control target
= control target key end

     0   :  { %8 = vsyncpa [#allocation3], 0  ;;  %s939_s0 = inlined_call_operand.hbm [shape: f32[2,4,8,128], index: 0, kind: input, shape index: {}]   ;;  %s940_s1 = inlined_call_operand.hbm [shape: s32[2,1,8,128], index: 1, kind: input, shape index: {}]   ;;  %s941_s2 = inlined_call_operand.vmem [shape: f32[4,128], index: 2, kind: input, shape index: {}]   ;;  %s942_s3 = inlined_call_operand.hbm [shape: f32[2,1,8,128], index: 3, kind: output, shape index: {}]  }
   0x1   :  { %10 = vsyncpa [#allocation3 + $0x1], 0 }
   0x2   :  { %11 = vsyncpa [#allocation6], 0 }
   0x3   :  { %13 = vsyncpa [#allocation6 + $0x1], 0 }
   0x4   :  { %14 = vsyncpa [#allocation4], 0 }
   0x5   :  { %16 = vsyncpa [#allocation4 + $0x1], 0  ;;  %s709_s12 = smov 0   ;;  %s711_s13 = smov 0  }
   0x6   :  { %s713_s14 = smov 0   ;;  %s715_s15 = smov 0  }
   0x7   :  { %s717_s16 = smov 0   ;;  %s719_s17 = smov 0  }
   0x8 LB: > { %s434_s18 = sadd.s32 4294967295, %s682_s17   ;;  %s435_s19 = sadd.s32 4294967294, %s682_s17   ;;  %s682_s17 = sphi %s719_s17, %s22_s17   ;;  %s678_s16 = sphi %s717_s16, %s961_s16   ;;  %s674_s15 = sphi %s715_s15, %s960_s15   ;;  %s670_s14 = sphi %s713_s14, %s959_s14   ;;  %s666_s13 = sphi %s711_s13, %s958_s13   ;;  %s662_s12 = sphi %s709_s12, %s957_s12  }
   0x9   : > { %s34_s20 = sadd.s32 1, %s678_s16  ;;  %s43_s21 = sadd.s32 1, %s670_s14 }
   0xa   : > { %p36_p0 = scmp.ge.s32.totalorder %s34_s20, 2  ;;  %p50_p1 = scmp.ne.s32.totalorder %s670_s14, %s666_s13 }
   0xb   : > { %p51_p2 = scmp.eq.s32.totalorder %s682_s17, 0  ;;  %p56_p3 = scmp.ne.s32.totalorder %s666_s13, %s662_s12 }
   0xc   : > { %s963_s20 = smov (%p36_p0, %s34_s20), 0  ;;  %p57_p5 = scmp.eq.s32.totalorder %s434_s18, 0 }
   0xd   : > { %p750_p4 = por %p51_p2, %p50_p1  ;;  %s38_s23 = ssub.s32 %s678_s16, %s963_s20 }
   0xe   : > { %p131_p6 = scmp.eq.s32.totalorder %s434_s18, 1  ;;  %p41_p7 = scmp.eq.s32.totalorder %s38_s23, 0 }
   0xf   : > { %p756_p8 = por %p57_p5, %p56_p3  ;;  %p137_p10 = scmp.eq.s32.totalorder %s435_s19, 1 }
  0x10   : > { %p760_p9 = por %p131_p6, %p50_p1  ;;  %p472_p13 = scmp.lt.s32.totalorder %s682_s17, 2 }
  0x11   : > { %s946_s24 = scalar_select %p756_p8, 1, 0 }
  0x12   : > { %s947_s25 = scalar_select %p760_p9, 1, 0 }
  0x13   : > { %s765_s26 = scalar_select %p41_p7, %s670_s14, %s43_s21  }
  0x14   : > { %p767_p11 = por %p137_p10, %p56_p3  ;;  %s774_s28 = sand.u32 1, %s670_s14  }
  0x15   : > { %s438_s29 = sshll.u32 %s774_s28, 5  ;;  %s454_s30 = sshll.u32 %s678_s16, 9 }
  0x16   : > { %s948_s27 = scalar_select %p767_p11, 1, 0 }
  0x17   : > { %s781_s6 = scalar_lea.hbm %s939_s0, %s454_s30  ;;  %s164_s7 = scalar_lea.vmem [#allocation2], %s438_s29 }
  0x18   : > { %s172_s8 = sshll.u32 %s164_s7, 4  ;;  %p787_p0 = pnand %p472_p13, %p750_p4  ;;  %s783_s8 = int_to_ptr.vmem [resolvable:$true] %s172_s8 }
  0x19   : > { %s161_s10 = scalar_lea.sflag [#allocation3], %s774_s28  ;;  %s536_s11 = scalar_lea.hbm %s781_s6, 512 }
  0x1a   : > { %p537_p2 = scmp.ne.s32.totalorder %s781_s6, %s536_s11  ;;  %p538_p3 = pneg %p787_p0 }
  0x1b   : > { %s541_s21 = scalar_lea.hbm %s939_s0, 1024  ;;  %p542_p4 = scmp.lt.u32.totalorder %s781_s6, %s939_s0 }
  0x1c   : > { %p539_p5 = pnand %p538_p3, %p537_p2  ;;  %p543_p7 = scmp.lt.u32.totalorder %s541_s21, %s536_s11 }
  0x1d   : > { %p545_p13 = scmp.lt.u32.totalorder %s536_s11, %s781_s6 }
  0x1e   : > { %p540_p6 = pneg %p539_p5  ;;  %p544_p10 = por %p543_p7, %p542_p4 }
  0x20   : > { %p546_p12 = por %p545_p13, %p544_p10 }
  0x22   : > { %p547_p1 = pnand %p546_p12, %p540_p6 }
  0x24   : > { %550 = shalt.err (!%p547_p1)
}
  0x25   : > { %s551_s29 = scalar_lea.vmem %s783_s8, 512  ;;  %s684_s30 = smov [#allocation2]  }
  0x26   : > { %p552_p2 = scmp.ne.s32.totalorder %s783_s8, %s551_s29  ;;  %s556_s4 = sshll.u32 %s684_s30, 4  ;;  %s557_s4 = int_to_ptr.vmem [resolvable:$false] %s556_s4 }
  0x27   : > { %s558_s5 = scalar_lea.vmem %s557_s4, 1024  ;;  %p559_p9 = scmp.lt.s32.totalorder %s783_s8, %s557_s4 }
  0x28   : > { %p554_p5 = pnand %p552_p2, %p538_p3  ;;  %p560_p4 = scmp.lt.s32.totalorder %s558_s5, %s551_s29 }
  0x2a   : > { %p555_p11 = pneg %p554_p5  ;;  %p561_p7 = por %p560_p4, %p559_p9 }
  0x2c   : > { %p562_p10 = pnand %p561_p7, %p555_p11 }
  0x2e   : > { %565 = shalt.err (!%p562_p10)
}
  0x2f   : > { %s685_s7 = smov 128   ;;  %s686_s11 = smov 8  }
  0x30   : > { %464 = dma.hbm_to_vmem [thread:$0]  (!%p787_p0), %s781_s6, 512, %s783_s8, %s161_s10, %s685_s7, %s685_s7, %s686_s11  }
  0x31   : > { %p199_p12 = scmp.lt.s32.totalorder %s682_s17, 3  ;;  %s441_s18 = sshll.u32 %s774_s28, 3 }
  0x32   : > { %s442_s19 = sshll.u32 %s678_s16, 7  ;;  %p950_p9 = scmp.ge.s32.totalorder %s682_s17, 1 }
  0x33   : > { %s832_s29 = scalar_lea.hbm %s940_s1, %s442_s19  ;;  %s186_s30 = scalar_lea.vmem [#allocation5], %s441_s18 }
  0x34   : > { %p825_p11 = pnand %p950_p9, %p199_p12  ;;  %s194_s4 = sshll.u32 %s186_s30, 4  ;;  %s195_s4 = int_to_ptr.vmem [resolvable:$true] %s194_s4 }
  0x35   : > { %s183_s6 = scalar_lea.sflag [#allocation6], %s774_s28  ;;  %s566_s8 = scalar_lea.hbm %s832_s29, 128 }
  0x36   : > { %s951_s21 = scalar_select %p825_p11, 1, 0 }
  0x37   : > { %p567_p1 = scmp.ne.s32.totalorder %s832_s29, %s566_s8  ;;  %s571_s7 = scalar_lea.hbm %s940_s1, 256 }
  0x38   : > { %p572_p2 = scmp.lt.u32.totalorder %s832_s29, %s940_s1  ;;  %p573_p5 = scmp.lt.u32.totalorder %s571_s7, %s566_s8 }
  0x39   : > { %p569_p6 = pnand %p567_p1, %p538_p3  ;;  %p575_p7 = scmp.lt.u32.totalorder %s566_s8, %s832_s29 }
  0x3a   : > { %p574_p4 = por %p573_p5, %p572_p2 }
  0x3b   : > { %p570_p13 = pneg %p569_p6 }
  0x3c   : > { %p576_p10 = por %p575_p7, %p574_p4 }
  0x3e   : > { %p577_p12 = pnand %p576_p10, %p570_p13 }
  0x40   : > { %580 = shalt.err (!%p577_p12)
}
  0x41   : > { %s581_s28 = scalar_lea.vmem %s195_s4, 128  ;;  %s687_s18 = smov [#allocation5]  }
  0x42   : > { %p582_p9 = scmp.ne.s32.totalorder %s195_s4, %s581_s28  ;;  %s586_s22 = sshll.u32 %s687_s18, 4  ;;  %s587_s22 = int_to_ptr.vmem [resolvable:$false] %s586_s22 }
  0x43   : > { %s588_s23 = scalar_lea.vmem %s587_s22, 256  ;;  %p589_p8 = scmp.lt.s32.totalorder %s195_s4, %s587_s22 }
  0x44   : > { %p584_p1 = pnand %p582_p9, %p538_p3  ;;  %p590_p11 = scmp.lt.s32.totalorder %s588_s23, %s581_s28 }
  0x46   : > { %p585_p6 = pneg %p584_p1  ;;  %p591_p2 = por %p590_p11, %p589_p8 }
  0x48   : > { %p592_p5 = pnand %p591_p2, %p585_p6 }
  0x4a   : > { %595 = shalt.err (!%p592_p5)
}
  0x4b   : > { %467 = dma.hbm_to_vmem [thread:$0]  (!%p787_p0), %s832_s29, 128, %s195_s4, %s183_s6  }
  0x4c   : > { %p952_p13 = scmp.ne.s32.totalorder %s951_s21, 0 }
  0x4d   : > { %s857_s30 = sand.u32 (!%p952_p13), 1, %s666_s13   ;;  %p953_p3 = scmp.ne.s32.totalorder (!%p952_p13), %s946_s24, 0 }
  0x4e   : > { %203 = sbr.rel (%p952_p13) target bundleno = 172 (0xac), region = 32  ;;  %s444_s8 = sshll.u32 (!%p952_p13), %s857_s30, 5 }
  0x4f   : > { %s206_s10 = scalar_lea.sflag (!%p952_p13), [#allocation3], %s857_s30  ;;  %s209_s5 = scalar_lea.vmem (!%p952_p13), [#allocation2], %s444_s8 }
  0x55   : > { %649 = dma.done.wait (%p953_p3), %s206_s10, 512  }
  0x56   : > { %651 = vsyncadd (%p953_p3), %s206_s10, 4294966784  ;;  %s445_s9 = sshll.u32 %s857_s30, 3  ;;  %s215_s21 = scalar_lea.sflag [#allocation6], %s857_s30 }
  0x57   : > { %s218_s29 = scalar_lea.vmem [#allocation5], %s445_s9 }
  0x58   : > { %653 = dma.done.wait (%p953_p3), %s215_s21, 128  }
  0x59   : > { %655 = vsyncadd (%p953_p3), %s215_s21, 4294967168  ;;  %v248_v0 = vld [vmem:[%s209_s5] sm:$0xff]  ;;  %v447_v1 = vld [vmem:[%s209_s5 + $0x8] sm:$0xff]  ;;  %v251_v26 = vlaneseq  ;;  %s245_s6 = scalar_lea.vmem [#allocation7], %s445_s9  ;;  %s451_s11 = sshll.u32 %s674_s15, 7 }
  0x5a   : > { %v448_v2 = vld [vmem:[%s209_s5 + $0x10] sm:$0xff]  ;;  %v258_v3 = vmax.f32 %v248_v0, %v447_v1  ;;  %v449_v4 = vld [vmem:[%s209_s5 + $0x18] sm:$0xff]  ;;  %v246_v15 = vld [vmem:[%s218_s29] sm:$0xff]  ;;  %s329_s7 = sshll.u32 %s245_s6, 4  ;;  %s892_s18 = scalar_lea.hbm %s942_s3, %s451_s11  ;;  %s887_s7 = int_to_ptr.vmem [resolvable:$true] %s329_s7 }
  0x5b   : > { %vm249_vm0 = vcmp.eq.s32.totalorder %v246_v15, 0  ;;  %vm259_vm1 = vcmp.eq.s32.totalorder %v246_v15, 1  ;;  %vm269_vm2 = vcmp.eq.s32.totalorder %v246_v15, 2  ;;  %vm279_vm3 = vcmp.eq.s32.totalorder %v246_v15, 3  ;;  %v247_v34 = vld [vmem:[%s941_s2] sm:$0xf] }
  0x5c   : > { %v268_v5 = vmax.f32 %v258_v3, %v448_v2  ;;  %v250_v22 = vsel %vm249_vm0, %v248_v0, 0.0  ;;  %v252_v30 = vshrl.u32 %v251_v26, 7  ;;  %s315_s22 = scalar_lea.sflag [#allocation4], %s857_s30  ;;  %s596_s23 = scalar_lea.vmem %s887_s7, 128 }
  0x5d   : > { %v260_v24 = vsel %vm259_vm1, %v447_v1, %v250_v22  ;;  %p597_p8 = scmp.ne.s32.totalorder %s887_s7, %s596_s23  ;;  %p954_p0 = scmp.ne.s32.totalorder %s947_s25, 0 }
  0x5e   : > { %v278_v6 = vmax.f32 %v268_v5, %v449_v4  ;;  %v270_v25 = vsel %vm269_vm2, %v448_v2, %v260_v24  ;;  %v253_v33 = vsub.s32 0, %v252_v30  ;;  %v263_v36 = vsub.s32 1, %v252_v30  ;;  %s688_s15 = smov [#allocation7]  }
  0x5f   : > { %v280_v27 = vsel %vm279_vm3, %v449_v4, %v270_v25  ;;  %v273_v38 = vsub.s32 2, %v252_v30  ;;  %v283_v41 = vsub.s32 3, %v252_v30  ;;  %p598_p11 = pnand %p597_p8, %p954_p0  ;;  %s600_s8 = sshll.u32 %s688_s15, 4  ;;  %s601_s8 = int_to_ptr.vmem [resolvable:$false] %s600_s8 }
  0x60   : > { %v286_v7 = vsub.f32 %v248_v0, %v278_v6  ;;  %v289_v8 = vsub.f32 %v447_v1, %v278_v6  ;;  %v293_v9 = vsub.f32 %v448_v2, %v278_v6  ;;  %v297_v10 = vsub.f32 %v449_v4, %v278_v6  ;;  %s602_s10 = scalar_lea.vmem %s601_s8, 256  ;;  %p603_p7 = scmp.lt.s32.totalorder %s887_s7, %s601_s8 }
  0x61   : > { %v303_v28 = vsub.f32 %v280_v27, %v278_v6  ;;  %v254_v37 = vrot.slane %v247_v34, %v253_v33  ;;  %v264_v39 = vrot.slane %v247_v34, %v263_v36  ;;  %v274_v42 = vrot.slane %v247_v34, %v273_v38  ;;  %p599_p4 = pneg %p598_p11  ;;  %p604_p10 = scmp.lt.s32.totalorder %s602_s10, %s596_s23 }
  0x62   : > { %v287_v11 = vmul.f32 1.442695, %v286_v7  ;;  %v290_v12 = vmul.f32 1.442695, %v289_v8  ;;  %v294_v13 = vmul.f32 1.442695, %v293_v9  ;;  %v284_v45 = vrot.slane %v247_v34, %v283_v41 }
  0x63   : > { %v298_v14 = vmul.f32 1.442695, %v297_v10  ;;  %v255_v40 = vsel %vm249_vm0, %v254_v37, 0.0  ;;  %p605_p12 = por %p604_p10, %p603_p7 }
  0x64   : > { %524 = vpow2.f32 %v287_v11  ;;  %v265_v43 = vsel %vm259_vm1, %v264_v39, %v255_v40 }
  0x65   : > { %526 = vpow2.f32 %v290_v12  ;;  %v275_v46 = vsel %vm269_vm2, %v274_v42, %v265_v43  ;;  %p606_p9 = pnand %p605_p12, %p599_p4 }
  0x66   : > { %528 = vpow2.f32 %v294_v13  ;;  %v285_v49 = vsel %vm279_vm3, %v284_v45, %v275_v46 }
  0x67   : > { %530 = vpow2.f32 %v298_v14 }
  0x6e   : > { %v525_v16 = vpop.eup %524 }
  0x6f   : > { %v527_v17 = vpop.eup %526 }
  0x70   : > { %v529_v18 = vpop.eup %528  ;;  %v292_v19 = vadd.f32 %v527_v17, %v525_v16 }
  0x71   : > { %v531_v20 = vpop.eup %530 }
  0x72   : > { %v296_v21 = vadd.f32 %v529_v18, %v292_v19 }
  0x74   : > { %v300_v23 = vadd.f32 %v531_v20, %v296_v21 }
  0x76   : > { %532 = vlog2.f32 %v300_v23 }
  0x80   : > { %v533_v29 = vpop.eup %532 }
  0x81   : > { %v302_v31 = vmul.f32 0.6931472, %v533_v29 }
  0x83   : > { %v304_v32 = vsub.f32 %v303_v28, %v302_v31 }
  0x85   : > { %v305_v35 = vmul.f32 1.442695, %v304_v32 }
  0x87   : > { %534 = vpow2.f32 %v305_v35 }
  0x91   : > { %v535_v44 = vpop.eup %534 }
  0x92   : > { %v307_v47 = vsub.f32 1.0, %v535_v44 }
  0x94   : > { %v308_v48 = vmax.f32 %v307_v47, 0.0 }
  0x96   : > { %v309_v50 = vmul.f32 %v308_v48, %v308_v48 }
  0x98   : > { %v310_v51 = vmul.f32 %v309_v50, %v285_v49 }
  0x9a   : > { %v311_v52 = vsub.f32 0.0, %v310_v51 }
  0x9c   : > { %v312_v53 = vmul.f32 %v311_v52, %v304_v32 }
  0x9e   : > { %313 = vst [vmem:[%s245_s6] sm:$0xff] %v312_v53 }
  0x9f   : > { %609 = shalt.err (!%p606_p9)
}
  0xa0   : > { %s610_s30 = scalar_lea.hbm %s892_s18, 128  ;;  %s614_s21 = scalar_lea.hbm %s942_s3, 256 }
  0xa1   : > { %p611_p1 = scmp.ne.s32.totalorder %s892_s18, %s610_s30  ;;  %p615_p5 = scmp.lt.u32.totalorder %s892_s18, %s942_s3 }
  0xa2   : > { %p616_p13 = scmp.lt.u32.totalorder %s614_s21, %s610_s30  ;;  %p618_p8 = scmp.lt.u32.totalorder %s610_s30, %s892_s18 }
  0xa3   : > { %p612_p6 = pnand %p611_p1, %p954_p0 }
  0xa4   : > { %p617_p3 = por %p616_p13, %p615_p5 }
  0xa5   : > { %p613_p2 = pneg %p612_p6 }
  0xa6   : > { %p619_p11 = por %p618_p8, %p617_p3 }
  0xa8   : > { %p620_p4 = pnand %p619_p11, %p613_p2 }
  0xaa   : > { %623 = shalt.err (!%p620_p4)
}
  0xab   : > { %459 = dma.vmem_to_hbm [thread:$0]  (%p954_p0), %s887_s7, 128, %s892_s18, %s315_s22  }
  0xac PF: > { %s341_s4 = sand.u32 1, %s662_s12   ;;  %p955_p7 = scmp.ne.s32.totalorder %s948_s27, 0 }
  0xad   : > { %p956_p10 = scmp.ge.s32.totalorder %s682_s17, 2  ;;  %s342_s6 = scalar_lea.sflag [#allocation4], %s341_s4 }
  0xaf   : > { %p469_p12 = pnand %p956_p10, %p955_p7 }
  0xb1   : > { %657 = dma.done.wait (!%p469_p12), %s342_s6, 128  }
  0xb2   : > { %659 = vsyncadd (!%p469_p12), %s342_s6, 4294967168  ;;  %s22_s17 = sadd.s32 1, %s682_s17   ;;  %s957_s12 = smov %s666_s13 }
  0xb3   : > { %p19_p9 = scmp.ge.s32.totalorder %s22_s17, 4   ;;  %s958_s13 = smov %s670_s14 }
  0xb4   : > { %s959_s14 = smov %s765_s26  ;;  %s960_s15 = smov %s678_s16 }
  0xb5   : > { %s961_s16 = smov %s963_s20  ;;  %21 = sbr.rel (!%p19_p9) target bundleno = 8 (0x8), region = 93 }
  0xbc   :  { %347 = vsyncpa [#allocation3], 1 }
  0xbd   :  { %349 = vsyncpa [#allocation3 + $0x1], 1 }
  0xbe   :  { %350 = vsyncpa [#allocation6], 1 }
  0xbf   :  { %352 = vsyncpa [#allocation6 + $0x1], 1 }
  0xc0   :  { %353 = vsyncpa [#allocation4], 1 }
  0xc1   :  { %355 = vsyncpa [#allocation4 + $0x1], 1 }

</bundles_post_ra>
